<compile_context>
chip_gen: v7x
topology: tpu7x:2x2x1
jax: 0.10.0
libtpu: 0.0.40
codegen_flags: <defaults>
</compile_context>

<pallas_src>
import functools

import jax
import jax.numpy as jnp
from jax.experimental import pallas as pl
from jax.experimental.pallas import tpu as pltpu  # noqa: F401  (TPU backend)

LANE = 128      # pad every feature dim to the 128-lane vreg width
SUBLANE = 8     # pad batch rows to a sublane multiple


def _fused_mlp_kernel(x_ref, w_ref, b_ref, o_ref, *, n_layers: int):
    """Whole 7-layer MLP in one kernel body.

    x_ref: (B_pad, 128)    padded input activations
    w_ref: (L, 128, 128)   zero-padded stacked weights, layout (in, out)
    b_ref: (L, 1, 128)     zero-padded stacked biases
    o_ref: (B_pad, 128)    padded output (caller slices the real columns)
    """
    h = x_ref[...]
    for i in range(n_layers):  # static unroll: 7 chained MXU matmuls
        y = jnp.dot(h, w_ref[i], preferred_element_type=jnp.float32)
        y = y + b_ref[i]       # (1,128) row add; sublane broadcast is free on the VPU
        if i != n_layers - 1:
            # F.leaky_relu with default negative_slope=0.01
            y = jnp.where(y > 0, y, 0.01 * y)
        h = y
    o_ref[...] = h.astype(o_ref.dtype)


def fused_mlp(x_pad, w_stack, b_stack):
    """Single pallas_call: whole-array blocks, grid=(), everything VMEM-resident."""
    B_pad = x_pad.shape[0]
    n_layers = w_stack.shape[0]
    kernel = functools.partial(_fused_mlp_kernel, n_layers=n_layers)
    return pl.pallas_call(
        kernel,
        out_shape=jax.ShapeDtypeStruct((B_pad, LANE), jnp.float32),
        in_specs=[
            pl.BlockSpec(x_pad.shape, lambda: (0, 0)),
            pl.BlockSpec(w_stack.shape, lambda: (0, 0, 0)),
            pl.BlockSpec(b_stack.shape, lambda: (0, 0, 0)),
        ],
        out_specs=pl.BlockSpec((B_pad, LANE), lambda: (0, 0)),
    )(x_pad, w_stack, b_stack)


def init_fc_model_params(key, arch):
    """Deterministic parameter init mimicking nn.Linear's uniform init."""
    params = []
    for i in range(len(arch) - 1):
        fan_in, fan_out = arch[i], arch[i + 1]
        key, kw, kb = jax.random.split(key, 3)
        bound = 1.0 / (fan_in ** 0.5)
        w = jax.random.uniform(kw, (fan_in, fan_out), jnp.float32, -bound, bound)
        b = jax.random.uniform(kb, (fan_out,), jnp.float32, -bound, bound)
        params.append((w, b))
    return params


def pack_params(params):
    """Stack per-layer (w, b) into two zero-padded, lane-aligned arrays."""
    n_layers = len(params)
    w_stack = jnp.zeros((n_layers, LANE, LANE), jnp.float32)
    b_stack = jnp.zeros((n_layers, 1, LANE), jnp.float32)
    for i, (w, b) in enumerate(params):
        fi, fo = w.shape
        w_stack = w_stack.at[i, :fi, :fo].set(w)
        b_stack = b_stack.at[i, 0, :fo].set(b)
    return w_stack, b_stack


@functools.partial(jax.jit, static_argnames=("out_features",))
def fc_model_forward(x, w_stack, b_stack, out_features):
    """Forward pass of fc_model: 6 x (Linear + LeakyReLU) then a final Linear."""
    B, f_in = x.shape
    B_pad = -(-B // SUBLANE) * SUBLANE
    x_pad = jnp.zeros((B_pad, LANE), x.dtype).at[:B, :f_in].set(x)
    out_pad = fused_mlp(x_pad, w_stack, b_stack)
    return out_pad[:B, :out_features]


if __name__ == "__main__":
    # arch = [in, h1, h2, h3, h4, h5, h6, out]  (8 entries -> 7 Linear layers)
    arch = [32, 64, 64, 64, 64, 64, 64, 16]
    batch = 8

    key = jax.random.PRNGKey(0)
    key, kx = jax.random.split(key)
    x = jax.random.normal(kx, (batch, arch[0]), dtype=jnp.float32)

    params = init_fc_model_params(key, arch)
    w_stack, b_stack = pack_params(params)

    out = fc_model_forward(x, w_stack, b_stack, arch[-1])
    jax.block_until_ready(out)

    # Sanity check against a plain-JAX reference of the same forward pass.
    ref = x
    for i, (w, b) in enumerate(params):
        ref = ref @ w + b[None, :]
        if i != len(params) - 1:
            ref = jnp.where(ref > 0, ref, 0.01 * ref)
    assert out.shape == (batch, arch[-1])
    assert jnp.allclose(out, ref, atol=1e-5, rtol=1e-5)

    print("KERNEL_OK")
</pallas_src>

<mosaic_0001>
module attributes {stable_mosaic.version = 11 : i64} {
  func.func @_fused_mlp_kernel(%arg0: memref<8x128xf32, #tpu.memory_space<vmem>>, %arg1: memref<7x128x128xf32, #tpu.memory_space<vmem>>, %arg2: memref<7x1x128xf32, #tpu.memory_space<vmem>>, %arg3: memref<8x128xf32, #tpu.memory_space<vmem>>) attributes {dimension_semantics = [], scalar_prefetch = 0 : i64, scratch_operands = 0 : i64, tpu.core_type = #tpu.core_type<tc>} {
    %c0 = arith.constant 0 : index
    %c0_0 = arith.constant 0 : index
    %0 = vector.load %arg0[%c0, %c0_0] : memref<8x128xf32, #tpu.memory_space<vmem>>, vector<8x128xf32>
    %c0_1 = arith.constant 0 : index
    %c0_2 = arith.constant 0 : index
    %c0_3 = arith.constant 0 : index
    %1 = vector.load %arg1[%c0_1, %c0_2, %c0_3] : memref<7x128x128xf32, #tpu.memory_space<vmem>>, vector<1x128x128xf32>
    %2 = vector.shape_cast %1 : vector<1x128x128xf32> to vector<128x128xf32>
    %cst = arith.constant dense<0.000000e+00> : vector<8x128xf32>
    %3 = tpu.matmul %0, %2, %cst {dimension_numbers = #tpu.dot_dimension_numbers<[1], [0], [0], [1], [0, 0, 1, 1], [], []>} : vector<8x128xf32>, vector<128x128xf32>, vector<8x128xf32> -> vector<8x128xf32>
    %c0_4 = arith.constant 0 : index
    %c0_5 = arith.constant 0 : index
    %c0_6 = arith.constant 0 : index
    %4 = vector.load %arg2[%c0_4, %c0_5, %c0_6] : memref<7x1x128xf32, #tpu.memory_space<vmem>>, vector<1x1x128xf32>
    %5 = vector.shape_cast %4 : vector<1x1x128xf32> to vector<1x128xf32>
    %6 = vector.broadcast %5 : vector<1x128xf32> to vector<8x128xf32>
    %7 = arith.addf %3, %6 : vector<8x128xf32>
    %cst_7 = arith.constant 0.000000e+00 : f32
    %8 = vector.broadcast %cst_7 : f32 to vector<8x128xf32>
    %9 = arith.cmpf ogt, %7, %8 : vector<8x128xf32>
    %cst_8 = arith.constant 0.00999999977 : f32
    %10 = vector.broadcast %cst_8 : f32 to vector<8x128xf32>
    %11 = arith.mulf %10, %7 : vector<8x128xf32>
    %12 = arith.select %9, %7, %11 : vector<8x128xi1>, vector<8x128xf32>
    %c1 = arith.constant 1 : index
    %c0_9 = arith.constant 0 : index
    %c0_10 = arith.constant 0 : index
    %13 = vector.load %arg1[%c1, %c0_9, %c0_10] : memref<7x128x128xf32, #tpu.memory_space<vmem>>, vector<1x128x128xf32>
    %14 = vector.shape_cast %13 : vector<1x128x128xf32> to vector<128x128xf32>
    %cst_11 = arith.constant dense<0.000000e+00> : vector<8x128xf32>
    %15 = tpu.matmul %12, %14, %cst_11 {dimension_numbers = #tpu.dot_dimension_numbers<[1], [0], [0], [1], [0, 0, 1, 1], [], []>} : vector<8x128xf32>, vector<128x128xf32>, vector<8x128xf32> -> vector<8x128xf32>
    %c1_12 = arith.constant 1 : index
    %c0_13 = arith.constant 0 : index
    %c0_14 = arith.constant 0 : index
    %16 = vector.load %arg2[%c1_12, %c0_13, %c0_14] : memref<7x1x128xf32, #tpu.memory_space<vmem>>, vector<1x1x128xf32>
    %17 = vector.shape_cast %16 : vector<1x1x128xf32> to vector<1x128xf32>
    %18 = vector.broadcast %17 : vector<1x128xf32> to vector<8x128xf32>
    %19 = arith.addf %15, %18 : vector<8x128xf32>
    %cst_15 = arith.constant 0.000000e+00 : f32
    %20 = vector.broadcast %cst_15 : f32 to vector<8x128xf32>
    %21 = arith.cmpf ogt, %19, %20 : vector<8x128xf32>
    %cst_16 = arith.constant 0.00999999977 : f32
    %22 = vector.broadcast %cst_16 : f32 to vector<8x128xf32>
    %23 = arith.mulf %22, %19 : vector<8x128xf32>
    %24 = arith.select %21, %19, %23 : vector<8x128xi1>, vector<8x128xf32>
    %c2 = arith.constant 2 : index
    %c0_17 = arith.constant 0 : index
    %c0_18 = arith.constant 0 : index
    %25 = vector.load %arg1[%c2, %c0_17, %c0_18] : memref<7x128x128xf32, #tpu.memory_space<vmem>>, vector<1x128x128xf32>
    %26 = vector.shape_cast %25 : vector<1x128x128xf32> to vector<128x128xf32>
    %cst_19 = arith.constant dense<0.000000e+00> : vector<8x128xf32>
    %27 = tpu.matmul %24, %26, %cst_19 {dimension_numbers = #tpu.dot_dimension_numbers<[1], [0], [0], [1], [0, 0, 1, 1], [], []>} : vector<8x128xf32>, vector<128x128xf32>, vector<8x128xf32> -> vector<8x128xf32>
    %c2_20 = arith.constant 2 : index
    %c0_21 = arith.constant 0 : index
    %c0_22 = arith.constant 0 : index
    %28 = vector.load %arg2[%c2_20, %c0_21, %c0_22] : memref<7x1x128xf32, #tpu.memory_space<vmem>>, vector<1x1x128xf32>
    %29 = vector.shape_cast %28 : vector<1x1x128xf32> to vector<1x128xf32>
    %30 = vector.broadcast %29 : vector<1x128xf32> to vector<8x128xf32>
    %31 = arith.addf %27, %30 : vector<8x128xf32>
    %cst_23 = arith.constant 0.000000e+00 : f32
    %32 = vector.broadcast %cst_23 : f32 to vector<8x128xf32>
    %33 = arith.cmpf ogt, %31, %32 : vector<8x128xf32>
    %cst_24 = arith.constant 0.00999999977 : f32
    %34 = vector.broadcast %cst_24 : f32 to vector<8x128xf32>
    %35 = arith.mulf %34, %31 : vector<8x128xf32>
    %36 = arith.select %33, %31, %35 : vector<8x128xi1>, vector<8x128xf32>
    %c3 = arith.constant 3 : index
    %c0_25 = arith.constant 0 : index
    %c0_26 = arith.constant 0 : index
    %37 = vector.load %arg1[%c3, %c0_25, %c0_26] : memref<7x128x128xf32, #tpu.memory_space<vmem>>, vector<1x128x128xf32>
    %38 = vector.shape_cast %37 : vector<1x128x128xf32> to vector<128x128xf32>
    %cst_27 = arith.constant dense<0.000000e+00> : vector<8x128xf32>
    %39 = tpu.matmul %36, %38, %cst_27 {dimension_numbers = #tpu.dot_dimension_numbers<[1], [0], [0], [1], [0, 0, 1, 1], [], []>} : vector<8x128xf32>, vector<128x128xf32>, vector<8x128xf32> -> vector<8x128xf32>
    %c3_28 = arith.constant 3 : index
    %c0_29 = arith.constant 0 : index
    %c0_30 = arith.constant 0 : index
    %40 = vector.load %arg2[%c3_28, %c0_29, %c0_30] : memref<7x1x128xf32, #tpu.memory_space<vmem>>, vector<1x1x128xf32>
    %41 = vector.shape_cast %40 : vector<1x1x128xf32> to vector<1x128xf32>
    %42 = vector.broadcast %41 : vector<1x128xf32> to vector<8x128xf32>
    %43 = arith.addf %39, %42 : vector<8x128xf32>
    %cst_31 = arith.constant 0.000000e+00 : f32
    %44 = vector.broadcast %cst_31 : f32 to vector<8x128xf32>
    %45 = arith.cmpf ogt, %43, %44 : vector<8x128xf32>
    %cst_32 = arith.constant 0.00999999977 : f32
    %46 = vector.broadcast %cst_32 : f32 to vector<8x128xf32>
    %47 = arith.mulf %46, %43 : vector<8x128xf32>
    %48 = arith.select %45, %43, %47 : vector<8x128xi1>, vector<8x128xf32>
    %c4 = arith.constant 4 : index
    %c0_33 = arith.constant 0 : index
    %c0_34 = arith.constant 0 : index
    %49 = vector.load %arg1[%c4, %c0_33, %c0_34] : memref<7x128x128xf32, #tpu.memory_space<vmem>>, vector<1x128x128xf32>
    %50 = vector.shape_cast %49 : vector<1x128x128xf32> to vector<128x128xf32>
    %cst_35 = arith.constant dense<0.000000e+00> : vector<8x128xf32>
    %51 = tpu.matmul %48, %50, %cst_35 {dimension_numbers = #tpu.dot_dimension_numbers<[1], [0], [0], [1], [0, 0, 1, 1], [], []>} : vector<8x128xf32>, vector<128x128xf32>, vector<8x128xf32> -> vector<8x128xf32>
    %c4_36 = arith.constant 4 : index
    %c0_37 = arith.constant 0 : index
    %c0_38 = arith.constant 0 : index
    %52 = vector.load %arg2[%c4_36, %c0_37, %c0_38] : memref<7x1x128xf32, #tpu.memory_space<vmem>>, vector<1x1x128xf32>
    %53 = vector.shape_cast %52 : vector<1x1x128xf32> to vector<1x128xf32>
    %54 = vector.broadcast %53 : vector<1x128xf32> to vector<8x128xf32>
    %55 = arith.addf %51, %54 : vector<8x128xf32>
    %cst_39 = arith.constant 0.000000e+00 : f32
    %56 = vector.broadcast %cst_39 : f32 to vector<8x128xf32>
    %57 = arith.cmpf ogt, %55, %56 : vector<8x128xf32>
    %cst_40 = arith.constant 0.00999999977 : f32
    %58 = vector.broadcast %cst_40 : f32 to vector<8x128xf32>
    %59 = arith.mulf %58, %55 : vector<8x128xf32>
    %60 = arith.select %57, %55, %59 : vector<8x128xi1>, vector<8x128xf32>
    %c5 = arith.constant 5 : index
    %c0_41 = arith.constant 0 : index
    %c0_42 = arith.constant 0 : index
    %61 = vector.load %arg1[%c5, %c0_41, %c0_42] : memref<7x128x128xf32, #tpu.memory_space<vmem>>, vector<1x128x128xf32>
    %62 = vector.shape_cast %61 : vector<1x128x128xf32> to vector<128x128xf32>
    %cst_43 = arith.constant dense<0.000000e+00> : vector<8x128xf32>
    %63 = tpu.matmul %60, %62, %cst_43 {dimension_numbers = #tpu.dot_dimension_numbers<[1], [0], [0], [1], [0, 0, 1, 1], [], []>} : vector<8x128xf32>, vector<128x128xf32>, vector<8x128xf32> -> vector<8x128xf32>
    %c5_44 = arith.constant 5 : index
    %c0_45 = arith.constant 0 : index
    %c0_46 = arith.constant 0 : index
    %64 = vector.load %arg2[%c5_44, %c0_45, %c0_46] : memref<7x1x128xf32, #tpu.memory_space<vmem>>, vector<1x1x128xf32>
    %65 = vector.shape_cast %64 : vector<1x1x128xf32> to vector<1x128xf32>
    %66 = vector.broadcast %65 : vector<1x128xf32> to vector<8x128xf32>
    %67 = arith.addf %63, %66 : vector<8x128xf32>
    %cst_47 = arith.constant 0.000000e+00 : f32
    %68 = vector.broadcast %cst_47 : f32 to vector<8x128xf32>
    %69 = arith.cmpf ogt, %67, %68 : vector<8x128xf32>
    %cst_48 = arith.constant 0.00999999977 : f32
    %70 = vector.broadcast %cst_48 : f32 to vector<8x128xf32>
    %71 = arith.mulf %70, %67 : vector<8x128xf32>
    %72 = arith.select %69, %67, %71 : vector<8x128xi1>, vector<8x128xf32>
    %c6 = arith.constant 6 : index
    %c0_49 = arith.constant 0 : index
    %c0_50 = arith.constant 0 : index
    %73 = vector.load %arg1[%c6, %c0_49, %c0_50] : memref<7x128x128xf32, #tpu.memory_space<vmem>>, vector<1x128x128xf32>
    %74 = vector.shape_cast %73 : vector<1x128x128xf32> to vector<128x128xf32>
    %cst_51 = arith.constant dense<0.000000e+00> : vector<8x128xf32>
    %75 = tpu.matmul %72, %74, %cst_51 {dimension_numbers = #tpu.dot_dimension_numbers<[1], [0], [0], [1], [0, 0, 1, 1], [], []>} : vector<8x128xf32>, vector<128x128xf32>, vector<8x128xf32> -> vector<8x128xf32>
    %c6_52 = arith.constant 6 : index
    %c0_53 = arith.constant 0 : index
    %c0_54 = arith.constant 0 : index
    %76 = vector.load %arg2[%c6_52, %c0_53, %c0_54] : memref<7x1x128xf32, #tpu.memory_space<vmem>>, vector<1x1x128xf32>
    %77 = vector.shape_cast %76 : vector<1x1x128xf32> to vector<1x128xf32>
    %78 = vector.broadcast %77 : vector<1x128xf32> to vector<8x128xf32>
    %79 = arith.addf %75, %78 : vector<8x128xf32>
    %c0_55 = arith.constant 0 : index
    %c0_56 = arith.constant 0 : index
    %80 = vector.load %arg3[%c0_55, %c0_56] : memref<8x128xf32, #tpu.memory_space<vmem>>, vector<8x128xf32>
    tpu.vector_store %arg3[%c0_55, %c0_56], %79 {strides = array<i32>} : memref<8x128xf32, #tpu.memory_space<vmem>>, vector<8x128xf32>,
    return
  }
}

</mosaic_0001>

<bundles_post_ra>
// kernel: fc_model_forward.1
= control target key start
LH: loop header
LB: loop body
LE: loop exit
PB: predicated region body
PF: predicated region fallthrough
CT: control target
= control target key end

     0   :  { %8 = vsyncpa [#allocation3], 0  ;;  %s1472_s0 = inlined_call_operand.vmem [shape: f32[8,128], index: 0, kind: input, shape index: {}]   ;;  %s1473_s1 = inlined_call_operand.hbm [shape: f32[7,128,128], index: 1, kind: input, shape index: {}]   ;;  %s1474_s2 = inlined_call_operand.vmem [shape: f32[7,1,128], index: 2, kind: input, shape index: {}]   ;;  %s1475_s3 = inlined_call_operand.hbm [shape: f32[8,128], index: 3, kind: output, shape index: {}]  }
   0x1   :  { %9 = vsyncpa [#allocation4], 0  ;;  %s1327_s12 = smov [#allocation2]   ;;  %s1279_s16 = scalar_lea.hbm %s1473_s1, 14336 }
   0x2   :  { %s17_s13 = sshll.u32 %s1327_s12, 4  ;;  %p1280_p0 = scmp.ne.s32.totalorder %s1473_s1, %s1279_s16  ;;  %s18_s13 = int_to_ptr.vmem [resolvable:$true] %s17_s13 }
   0x3   :  { %p1283_p1 = scmp.lt.u32.totalorder %s1279_s16, %s1473_s1 }
   0x5   :  { %p1285_p2 = pnand %p1283_p1, %p1280_p0 }
   0x7   :  { %1288 = shalt.err (!%p1285_p2)
}
   0x8   :  { %s1289_s21 = scalar_lea.vmem %s18_s13, 14336  ;;  %p1294_p4 = scmp.lt.s32.totalorder %s18_s13, %s18_s13 }
   0x9   :  { %p1290_p3 = scmp.ne.s32.totalorder %s18_s13, %s1289_s21  ;;  %p1295_p5 = scmp.lt.s32.totalorder %s1289_s21, %s1289_s21 }
   0xb   :  { %p1296_p6 = por %p1295_p5, %p1294_p4 }
   0xd   :  { %p1297_p7 = pnand %p1296_p6, %p1290_p3 }
   0xf   :  { %1300 = shalt.err (!%p1297_p7)
}
  0x10   :  { %s1328_s22 = smov 128   ;;  %s1329_s23 = smov 8  }
  0x11   :  { %23 = dma.hbm_to_vmem [thread:$0]  %s1473_s1, 14336, %s18_s13, [#allocation3], %s1328_s22, %s1328_s22, %s1329_s23  }
  0x12   :  { %1323 = dma.done.wait [#allocation3], 14336  }
  0x13   :  { %1324 = vsyncadd [#allocation3], 4294952960  ;;  %v1330_v0 = vmov 0.0|0.0   ;;  %vm1331_vm0 = vmmov 0   ;;  %v1332_v1 = vmov 0.0   ;;  %v30_v2 = vld [vmem:[#allocation2] sm:$0xff] }
  0x14   :  { %1104 = vmatprep.subr.bf16.mxu0 %v1330_v0  ;;  %891 = vmatprep.mubr.msk.f32.mxu0 %vm1331_vm0, %v1332_v1  ;;  %v31_v3 = vld [vmem:[#allocation2 + $0x8] sm:$0xff]  ;;  %v32_v4 = vld [vmem:[#allocation2 + $0x10] sm:$0xff]  ;;  %v33_v6 = vld [vmem:[#allocation2 + $0x18] sm:$0xff]  ;;  %s1333_s13 = smov [#allocation5]  }
  0x15   :  { %1128 = vmatprep.subr.bf16.mxu1 %v1330_v0  ;;  %926 = vmatprep.mubr.msk.f32.mxu1 %vm1331_vm0, %v1332_v1  ;;  %v1105_v5 = vpack.c.bf16 %v31_v3, %v30_v2  ;;  %v1108_v7 = vpack.c.bf16 %v33_v6, %v32_v4  ;;  %v34_v8 = vld [vmem:[#allocation2 + $0x20] sm:$0xff]  ;;  %v35_v9 = vld [vmem:[#allocation2 + $0x28] sm:$0xff]  ;;  %v129_v12 = vld [vmem:[#allocation2 + $0x90] sm:$0xff]  ;;  %s718_s14 = sshll.u32 %s1333_s13, 4  ;;  %s719_s14 = int_to_ptr.vmem [resolvable:$true] %s718_s14 }
  0x16   :  { %v127_v10 = vld [vmem:[#allocation2 + $0x80] sm:$0xff]  ;;  %v128_v11 = vld [vmem:[#allocation2 + $0x88] sm:$0xff]  ;;  %v130_v13 = vld [vmem:[#allocation2 + $0x98] sm:$0xff]  ;;  %v1111_v14 = vpack.c.bf16 %v35_v9, %v34_v8  ;;  %s1301_s15 = scalar_lea.vmem %s719_s14, 128  ;;  %p1306_p9 = scmp.lt.s32.totalorder %s719_s14, %s719_s14 }
  0x17   :  { %1106 = vmatpush3.bf16.msra.mxu0 %v1105_v5  ;;  %v1129_v15 = vpack.c.bf16 %v128_v11, %v127_v10  ;;  %v36_v16 = vld [vmem:[#allocation2 + $0x30] sm:$0xff]  ;;  %v37_v17 = vld [vmem:[#allocation2 + $0x38] sm:$0xff]  ;;  %v1132_v18 = vpack.c.bf16 %v130_v13, %v129_v12  ;;  %v131_v19 = vld [vmem:[#allocation2 + $0xa0] sm:$0xff]  ;;  %p1302_p8 = scmp.ne.s32.totalorder %s719_s14, %s1301_s15  ;;  %p1307_p10 = scmp.lt.s32.totalorder %s1301_s15, %s1301_s15 }
  0x18   :  { %1107 = vmatprep.subr.bf16.mxu0 %v1330_v0  ;;  %v132_v20 = vld [vmem:[#allocation2 + $0xa8] sm:$0xff]  ;;  %v1114_v21 = vpack.c.bf16 %v37_v17, %v36_v16  ;;  %v38_v22 = vld [vmem:[#allocation2 + $0x40] sm:$0xff]  ;;  %v133_v25 = vld [vmem:[#allocation2 + $0xb0] sm:$0xff] }
  0x19   :  { %1130 = vmatpush3.bf16.msra.mxu1 %v1129_v15  ;;  %v39_v23 = vld [vmem:[#allocation2 + $0x48] sm:$0xff]  ;;  %v1135_v24 = vpack.c.bf16 %v132_v20, %v131_v19  ;;  %v134_v26 = vld [vmem:[#allocation2 + $0xb8] sm:$0xff]  ;;  %v40_v28 = vld [vmem:[#allocation2 + $0x50] sm:$0xff]  ;;  %p1308_p11 = por %p1307_p10, %p1306_p9 }
  0x1a   :  { %1131 = vmatprep.subr.bf16.mxu1 %v1330_v0  ;;  %v1117_v27 = vpack.c.bf16 %v39_v23, %v38_v22  ;;  %v41_v29 = vld [vmem:[#allocation2 + $0x58] sm:$0xff]  ;;  %v1138_v30 = vpack.c.bf16 %v134_v26, %v133_v25  ;;  %v135_v31 = vld [vmem:[#allocation2 + $0xc0] sm:$0xff]  ;;  %v136_v32 = vld [vmem:[#allocation2 + $0xc8] sm:$0xff] }
  0x1b   :  { %1109 = vmatpush3.bf16.msra.mxu0 %v1108_v7  ;;  %v1120_v33 = vpack.c.bf16 %v41_v29, %v40_v28  ;;  %v42_v34 = vld [vmem:[#allocation2 + $0x60] sm:$0xff]  ;;  %v43_v35 = vld [vmem:[#allocation2 + $0x68] sm:$0xff]  ;;  %v1141_v36 = vpack.c.bf16 %v136_v32, %v135_v31  ;;  %v137_v37 = vld [vmem:[#allocation2 + $0xd0] sm:$0xff]  ;;  %p1309_p12 = pnand %p1308_p11, %p1302_p8 }
  0x1c   :  { %1110 = vmatprep.subr.bf16.mxu0 %v1330_v0  ;;  %v138_v38 = vld [vmem:[#allocation2 + $0xd8] sm:$0xff]  ;;  %v1123_v39 = vpack.c.bf16 %v43_v35, %v42_v34  ;;  %v44_v40 = vld [vmem:[#allocation2 + $0x70] sm:$0xff]  ;;  %v139_v43 = vld [vmem:[#allocation2 + $0xe0] sm:$0xff] }
  0x1d   :  { %1133 = vmatpush3.bf16.msra.mxu1 %v1132_v18  ;;  %v45_v41 = vld [vmem:[#allocation2 + $0x78] sm:$0xff]  ;;  %v1144_v42 = vpack.c.bf16 %v138_v38, %v137_v37  ;;  %v140_v44 = vld [vmem:[#allocation2 + $0xe8] sm:$0xff]  ;;  %v29_v47 = vld [vmem:[%s1472_s0] sm:$0xff] }
  0x1e   :  { %1134 = vmatprep.subr.bf16.mxu1 %v1330_v0  ;;  %v1126_v45 = vpack.c.bf16 %v45_v41, %v44_v40  ;;  %v1147_v46 = vpack.c.bf16 %v140_v44, %v139_v43  ;;  %v141_v48 = vld [vmem:[#allocation2 + $0xf0] sm:$0xff]  ;;  %v142_v49 = vld [vmem:[#allocation2 + $0xf8] sm:$0xff]  ;;  %v225_v51 = vld [vmem:[#allocation2 + $0x100] sm:$0xff] }
  0x1f   :  { %1112 = vmatpush3.bf16.msra.mxu0 %v1111_v14  ;;  %v1150_v50 = vpack.c.bf16 %v142_v49, %v141_v48  ;;  %v226_v52 = vld [vmem:[#allocation2 + $0x108] sm:$0xff]  ;;  %v227_v53 = vld [vmem:[#allocation2 + $0x110] sm:$0xff]  ;;  %v228_v55 = vld [vmem:[#allocation2 + $0x118] sm:$0xff] }
  0x20   :  { %1113 = vmatprep.subr.bf16.mxu0 %v1330_v0  ;;  %v1153_v54 = vpack.c.bf16 %v226_v52, %v225_v51  ;;  %v1156_v56 = vpack.c.bf16 %v228_v55, %v227_v53  ;;  %v229_v57 = vld [vmem:[#allocation2 + $0x120] sm:$0xff]  ;;  %v230_v58 = vld [vmem:[#allocation2 + $0x128] sm:$0xff]  ;;  %v231_v60 = vld [vmem:[#allocation2 + $0x130] sm:$0xff] }
  0x21   :  { %1136 = vmatpush3.bf16.msra.mxu1 %v1135_v24  ;;  %v1159_v59 = vpack.c.bf16 %v230_v58, %v229_v57  ;;  %v232_v61 = vld [vmem:[#allocation2 + $0x138] sm:$0xff]  ;;  %v233_v63 = vld [vmem:[#allocation2 + $0x140] sm:$0xff]  ;;  %v234_v2 = vld [vmem:[#allocation2 + $0x148] sm:$0xff] }
  0x22   :  { %1137 = vmatprep.subr.bf16.mxu1 %v1330_v0  ;;  %v1162_v62 = vpack.c.bf16 %v232_v61, %v231_v60  ;;  %v1165_v3 = vpack.c.bf16 %v234_v2, %v233_v63  ;;  %v235_v4 = vld [vmem:[#allocation2 + $0x150] sm:$0xff]  ;;  %v236_v5 = vld [vmem:[#allocation2 + $0x158] sm:$0xff]  ;;  %v237_v7 = vld [vmem:[#allocation2 + $0x160] sm:$0xff] }
  0x23   :  { %1115 = vmatpush3.bf16.msra.mxu0 %v1114_v21  ;;  %v1168_v6 = vpack.c.bf16 %v236_v5, %v235_v4  ;;  %v238_v8 = vld [vmem:[#allocation2 + $0x168] sm:$0xff]  ;;  %v727_v10 = vld [vmem:[%s1474_s2] ss:$0 sm:$0xff]  ;;  %v239_v16 = vld [vmem:[#allocation2 + $0x170] sm:$0xff] }
  0x24   :  { %1116 = vmatprep.subr.bf16.mxu0 %v1330_v0  ;;  %v1171_v9 = vpack.c.bf16 %v238_v8, %v237_v7  ;;  %v240_v17 = vld [vmem:[#allocation2 + $0x178] sm:$0xff]  ;;  %v323_v19 = vld [vmem:[#allocation2 + $0x180] sm:$0xff]  ;;  %v324_v20 = vld [vmem:[#allocation2 + $0x188] sm:$0xff] }
  0x25   :  { %1139 = vmatpush3.bf16.msra.mxu1 %v1138_v30  ;;  %v1174_v18 = vpack.c.bf16 %v240_v17, %v239_v16  ;;  %v325_v21 = vld [vmem:[#allocation2 + $0x190] sm:$0xff]  ;;  %v1177_v22 = vpack.c.bf16 %v324_v20, %v323_v19  ;;  %v326_v23 = vld [vmem:[#allocation2 + $0x198] sm:$0xff]  ;;  %v327_v25 = vld [vmem:[#allocation2 + $0x1a0] sm:$0xff] }
  0x26   :  { %1140 = vmatprep.subr.bf16.mxu1 %v1330_v0  ;;  %v1180_v24 = vpack.c.bf16 %v326_v23, %v325_v21  ;;  %v328_v26 = vld [vmem:[#allocation2 + $0x1a8] sm:$0xff]  ;;  %v329_v28 = vld [vmem:[#allocation2 + $0x1b0] sm:$0xff]  ;;  %v330_v29 = vld [vmem:[#allocation2 + $0x1b8] sm:$0xff] }
  0x27   :  { %1118 = vmatpush3.bf16.msra.mxu0 %v1117_v27  ;;  %v1183_v27 = vpack.c.bf16 %v328_v26, %v327_v25  ;;  %v1186_v30 = vpack.c.bf16 %v330_v29, %v329_v28  ;;  %v331_v31 = vld [vmem:[#allocation2 + $0x1c0] sm:$0xff]  ;;  %v332_v32 = vld [vmem:[#allocation2 + $0x1c8] sm:$0xff]  ;;  %v333_v34 = vld [vmem:[#allocation2 + $0x1d0] sm:$0xff] }
  0x28   :  { %1119 = vmatprep.subr.bf16.mxu0 %v1330_v0  ;;  %v334_v35 = vld [vmem:[#allocation2 + $0x1d8] sm:$0xff]  ;;  %v335_v37 = vld [vmem:[#allocation2 + $0x1e0] sm:$0xff]  ;;  %v336_v38 = vld [vmem:[#allocation2 + $0x1e8] sm:$0xff] }
  0x29   :  { %1142 = vmatpush3.bf16.msra.mxu1 %v1141_v36  ;;  %v1192_v36 = vpack.c.bf16 %v334_v35, %v333_v34  ;;  %v729_v40 = vld [vmem:[%s1474_s2 + $0x1] ss:$0 sm:$0xff]  ;;  %v423_v51 = vld [vmem:[#allocation2 + $0x210] sm:$0xff]  ;;  %v424_v53 = vld [vmem:[#allocation2 + $0x218] sm:$0xff] }
  0x2a   :  { %1143 = vmatprep.subr.bf16.mxu1 %v1330_v0  ;;  %v421_v49 = vld [vmem:[#allocation2 + $0x200] sm:$0xff]  ;;  %v427_v58 = vld [vmem:[#allocation2 + $0x230] sm:$0xff]  ;;  %v522_v21 = vld [vmem:[#allocation2 + $0x298] sm:$0xff] }
  0x2b   :  { %1121 = vmatpush3.bf16.msra.mxu0 %v1120_v33  ;;  %v1189_v33 = vpack.c.bf16 %v332_v32, %v331_v31  ;;  %v425_v55 = vld [vmem:[#allocation2 + $0x220] sm:$0xff]  ;;  %v431_v2 = vld [vmem:[#allocation2 + $0x250] sm:$0xff] }
  0x2c   :  { %1122 = vmatprep.subr.bf16.mxu0 %v1330_v0  ;;  %v429_v61 = vld [vmem:[#allocation2 + $0x240] sm:$0xff]  ;;  %v521_v19 = vld [vmem:[#allocation2 + $0x290] sm:$0xff] }
  0x2d   :  { %1145 = vmatpush3.bf16.msra.mxu1 %v1144_v42  ;;  %v433_v5 = vld [vmem:[#allocation2 + $0x260] sm:$0xff]  ;;  %v525_v26 = vld [vmem:[#allocation2 + $0x2b0] sm:$0xff] }
  0x2e   :  { %1146 = vmatprep.subr.bf16.mxu1 %v1330_v0  ;;  %v731_v8 = vld [vmem:[%s1474_s2 + $0x2] ss:$0 sm:$0xff]  ;;  %v529_v32 = vld [vmem:[#allocation2 + $0x2d0] sm:$0xff] }
  0x2f   :  { %1124 = vmatpush3.bf16.msra.mxu0 %v1123_v39  ;;  %v1195_v39 = vpack.c.bf16 %v336_v38, %v335_v37  ;;  %v519_v17 = vld [vmem:[#allocation2 + $0x280] sm:$0xff] }
  0x30   :  { %1125 = vmatprep.subr.bf16.mxu0 %v1330_v0  ;;  %v523_v23 = vld [vmem:[#allocation2 + $0x2a0] sm:$0xff] }
  0x31   :  { %1148 = vmatpush3.bf16.msra.mxu1 %v1147_v46  ;;  %v337_v46 = vld [vmem:[#allocation2 + $0x1f0] sm:$0xff]  ;;  %v527_v29 = vld [vmem:[#allocation2 + $0x2c0] sm:$0xff] }
  0x32   :  { %1149 = vmatprep.subr.bf16.mxu1 %v1330_v0  ;;  %v531_v35 = vld [vmem:[#allocation2 + $0x2e0] sm:$0xff] }
  0x33   :  { %1127 = vmatpush3.bf16.msra.mxu0 %v1126_v45  ;;  %v733_v38 = vld [vmem:[%s1474_s2 + $0x3] ss:$0 sm:$0xff] }
  0x34   :  { %1152 = vmatprep.subr.bf16.mxu0 %v1330_v0 }
  0x35   :  { %1151 = vmatpush3.bf16.msra.mxu1 %v1150_v50  ;;  %v422_v50 = vld [vmem:[#allocation2 + $0x208] sm:$0xff] }
  0x36   :  { %892 = vmatmul.mubr.f32.vlgmr.msra.gmra.mrb[0].mxu0 %v29_v47  ;;  %1176 = vmatprep.subr.bf16.mxu1 %v1330_v0  ;;  %v338_v47 = vld [vmem:[#allocation2 + $0x1f8] sm:$0xff]  ;;  %v1201_v52 = vpack.c.bf16 %v422_v50, %v421_v49  ;;  %v619_v49 = vld [vmem:[#allocation2 + $0x310] sm:$0xff] }
  0x37   :  { %961 = vmatprep.mubr.msk.f32.mxu0 %vm1331_vm0, %v1332_v1  ;;  %1154 = vmatpush3.bf16.msra.mxu0 %v1153_v54  ;;  %v1198_v48 = vpack.c.bf16 %v338_v47, %v337_v46  ;;  %v1204_v54 = vpack.c.bf16 %v424_v53, %v423_v51  ;;  %v617_v47 = vld [vmem:[#allocation2 + $0x300] sm:$0xff]  ;;  %v620_v51 = vld [vmem:[#allocation2 + $0x318] sm:$0xff] }
  0x38   :  { %1155 = vmatprep.subr.bf16.mxu0 %v1330_v0  ;;  %v621_v53 = vld [vmem:[#allocation2 + $0x320] sm:$0xff] }
  0x3b   :  { %1157 = vmatpush3.bf16.msra.mxu0 %v1156_v56  ;;  %v426_v56 = vld [vmem:[#allocation2 + $0x228] sm:$0xff] }
  0x3c   :  { %1158 = vmatprep.subr.bf16.mxu0 %v1330_v0  ;;  %v1207_v57 = vpack.c.bf16 %v426_v56, %v425_v55  ;;  %v624_v56 = vld [vmem:[#allocation2 + $0x338] sm:$0xff] }
  0x3f   :  { %1160 = vmatpush3.bf16.msra.mxu0 %v1159_v59  ;;  %v428_v59 = vld [vmem:[#allocation2 + $0x238] sm:$0xff] }
  0x40   :  { %1161 = vmatprep.subr.bf16.mxu0 %v1330_v0  ;;  %v1210_v60 = vpack.c.bf16 %v428_v59, %v427_v58  ;;  %v625_v58 = vld [vmem:[#allocation2 + $0x340] sm:$0xff]  ;;  %v626_v59 = vld [vmem:[#allocation2 + $0x348] sm:$0xff] }
  0x43   :  { %1163 = vmatpush3.bf16.msra.mxu0 %v1162_v62  ;;  %v430_v62 = vld [vmem:[#allocation2 + $0x248] sm:$0xff] }
  0x44   :  { %1164 = vmatprep.subr.bf16.mxu0 %v1330_v0  ;;  %v1213_v63 = vpack.c.bf16 %v430_v62, %v429_v61  ;;  %v627_v61 = vld [vmem:[#allocation2 + $0x350] sm:$0xff]  ;;  %v628_v62 = vld [vmem:[#allocation2 + $0x358] sm:$0xff] }
  0x47   :  { %1166 = vmatpush3.bf16.msra.mxu0 %v1165_v3  ;;  %v432_v3 = vld [vmem:[#allocation2 + $0x258] sm:$0xff] }
  0x48   :  { %1167 = vmatprep.subr.bf16.mxu0 %v1330_v0  ;;  %v1216_v4 = vpack.c.bf16 %v432_v3, %v431_v2  ;;  %v629_v2 = vld [vmem:[#allocation2 + $0x360] sm:$0xff]  ;;  %v630_v3 = vld [vmem:[#allocation2 + $0x368] sm:$0xff] }
  0x4b   :  { %1169 = vmatpush3.bf16.msra.mxu0 %v1168_v6  ;;  %v434_v6 = vld [vmem:[#allocation2 + $0x268] sm:$0xff] }
  0x4c   :  { %1170 = vmatprep.subr.bf16.mxu0 %v1330_v0  ;;  %v1219_v7 = vpack.c.bf16 %v434_v6, %v433_v5  ;;  %v735_v5 = vld [vmem:[%s1474_s2 + $0x4] ss:$0 sm:$0xff] }
  0x4f   :  { %1172 = vmatpush3.bf16.msra.mxu0 %v1171_v9 }
  0x50   :  { %1173 = vmatprep.subr.bf16.mxu0 %v1330_v0 }
  0x53   :  { %1175 = vmatpush3.bf16.msra.mxu0 %v1174_v18  ;;  %v520_v18 = vld [vmem:[#allocation2 + $0x288] sm:$0xff] }
  0x54   :  { %1200 = vmatprep.subr.bf16.mxu0 %v1330_v0  ;;  %v1225_v20 = vpack.c.bf16 %v520_v18, %v519_v17 }
 0x109   :  { %v119_v11 = vpop.f32.mrb[0].mxu0 }
 0x10a   :  { %v120_v12 = vadd.f32 %v727_v10, %v119_v11  ;;  %v893_v13 = vpop.f32.mrb[1].mxu0 }
 0x10c   :  { %v124_v14 = vmul.f32 0.01, %v120_v12  ;;  %vm123_vm1 = vcmp.gt.f32.partialorder %v120_v12, 0.0 }
 0x10e   :  { %v125_v15 = vsel %vm123_vm1, %v120_v12, %v124_v14  ;;  %v435_v14 = vld [vmem:[#allocation2 + $0x270] sm:$0xff] }
 0x10f   :  { %927 = vmatmul.mubr.f32.vlgmr.msra.gmra.mrb[0].mxu1 %v125_v15  ;;  %v436_v15 = vld [vmem:[#allocation2 + $0x278] sm:$0xff] }
 0x110   :  { %996 = vmatprep.mubr.msk.f32.mxu1 %vm1331_vm0, %v1332_v1  ;;  %1178 = vmatpush3.bf16.msra.mxu1 %v1177_v22  ;;  %v1222_v16 = vpack.c.bf16 %v436_v15, %v435_v14  ;;  %v1228_v22 = vpack.c.bf16 %v522_v21, %v521_v19  ;;  %v737_v14 = vld [vmem:[%s1474_s2 + $0x5] ss:$0 sm:$0xff]  ;;  %v739_v19 = vld [vmem:[%s1474_s2 + $0x6] ss:$0 sm:$0xff] }
 0x111   :  { %1179 = vmatprep.subr.bf16.mxu1 %v1330_v0 }
 0x114   :  { %1181 = vmatpush3.bf16.msra.mxu1 %v1180_v24  ;;  %v524_v24 = vld [vmem:[#allocation2 + $0x2a8] sm:$0xff] }
 0x115   :  { %1182 = vmatprep.subr.bf16.mxu1 %v1330_v0  ;;  %v1231_v25 = vpack.c.bf16 %v524_v24, %v523_v23 }
 0x118   :  { %1184 = vmatpush3.bf16.msra.mxu1 %v1183_v27  ;;  %v526_v27 = vld [vmem:[#allocation2 + $0x2b8] sm:$0xff] }
 0x119   :  { %1185 = vmatprep.subr.bf16.mxu1 %v1330_v0  ;;  %v1234_v28 = vpack.c.bf16 %v526_v27, %v525_v26 }
 0x11c   :  { %1187 = vmatpush3.bf16.msra.mxu1 %v1186_v30  ;;  %v528_v30 = vld [vmem:[#allocation2 + $0x2c8] sm:$0xff] }
 0x11d   :  { %1188 = vmatprep.subr.bf16.mxu1 %v1330_v0  ;;  %v1237_v31 = vpack.c.bf16 %v528_v30, %v527_v29 }
 0x120   :  { %1190 = vmatpush3.bf16.msra.mxu1 %v1189_v33  ;;  %v530_v33 = vld [vmem:[#allocation2 + $0x2d8] sm:$0xff] }
 0x121   :  { %1191 = vmatprep.subr.bf16.mxu1 %v1330_v0  ;;  %v1240_v34 = vpack.c.bf16 %v530_v33, %v529_v32 }
 0x124   :  { %1193 = vmatpush3.bf16.msra.mxu1 %v1192_v36  ;;  %v532_v36 = vld [vmem:[#allocation2 + $0x2e8] sm:$0xff] }
 0x125   :  { %1194 = vmatprep.subr.bf16.mxu1 %v1330_v0  ;;  %v1243_v37 = vpack.c.bf16 %v532_v36, %v531_v35 }
 0x128   :  { %1196 = vmatpush3.bf16.msra.mxu1 %v1195_v39 }
 0x129   :  { %1197 = vmatprep.subr.bf16.mxu1 %v1330_v0 }
 0x12c   :  { %1199 = vmatpush3.bf16.msra.mxu1 %v1198_v48  ;;  %v618_v48 = vld [vmem:[#allocation2 + $0x308] sm:$0xff] }
 0x12d   :  { %1224 = vmatprep.subr.bf16.mxu1 %v1330_v0  ;;  %v1249_v50 = vpack.c.bf16 %v618_v48, %v617_v47 }
 0x1e2   :  { %v217_v41 = vpop.f32.mrb[0].mxu1 }
 0x1e3   :  { %v218_v42 = vadd.f32 %v729_v40, %v217_v41  ;;  %v928_v43 = vpop.f32.mrb[1].mxu1 }
 0x1e5   :  { %vm221_vm2 = vcmp.gt.f32.partialorder %v218_v42, 0.0  ;;  %v222_v44 = vmul.f32 0.01, %v218_v42 }
 0x1e7   :  { %v223_v45 = vsel %vm221_vm2, %v218_v42, %v222_v44  ;;  %v533_v44 = vld [vmem:[#allocation2 + $0x2f0] sm:$0xff] }
 0x1e8   :  { %962 = vmatmul.mubr.f32.vlgmr.msra.gmra.mrb[2].mxu0 %v223_v45  ;;  %v534_v45 = vld [vmem:[#allocation2 + $0x2f8] sm:$0xff] }
 0x1e9   :  { %1031 = vmatprep.mubr.msk.f32.mxu0 %vm1331_vm0, %v1332_v1  ;;  %1202 = vmatpush3.bf16.msra.mxu0 %v1201_v52  ;;  %v1246_v46 = vpack.c.bf16 %v534_v45, %v533_v44  ;;  %v1252_v52 = vpack.c.bf16 %v620_v51, %v619_v49 }
 0x1ea   :  { %1203 = vmatprep.subr.bf16.mxu0 %v1330_v0 }
 0x1ed   :  { %1205 = vmatpush3.bf16.msra.mxu0 %v1204_v54  ;;  %v622_v54 = vld [vmem:[#allocation2 + $0x328] sm:$0xff] }
 0x1ee   :  { %1206 = vmatprep.subr.bf16.mxu0 %v1330_v0  ;;  %v1255_v55 = vpack.c.bf16 %v622_v54, %v621_v53 }
 0x1f1   :  { %1208 = vmatpush3.bf16.msra.mxu0 %v1207_v57 }
 0x1f2   :  { %1209 = vmatprep.subr.bf16.mxu0 %v1330_v0 }
 0x1f5   :  { %1211 = vmatpush3.bf16.msra.mxu0 %v1210_v60  ;;  %v1261_v60 = vpack.c.bf16 %v626_v59, %v625_v58 }
 0x1f6   :  { %1212 = vmatprep.subr.bf16.mxu0 %v1330_v0 }
 0x1f9   :  { %1214 = vmatpush3.bf16.msra.mxu0 %v1213_v63  ;;  %v1264_v63 = vpack.c.bf16 %v628_v62, %v627_v61 }
 0x1fa   :  { %1215 = vmatprep.subr.bf16.mxu0 %v1330_v0 }
 0x1fd   :  { %1217 = vmatpush3.bf16.msra.mxu0 %v1216_v4  ;;  %v1267_v4 = vpack.c.bf16 %v630_v3, %v629_v2 }
 0x1fe   :  { %1218 = vmatprep.subr.bf16.mxu0 %v1330_v0 }
 0x201   :  { %1220 = vmatpush3.bf16.msra.mxu0 %v1219_v7 }
 0x202   :  { %1221 = vmatprep.subr.bf16.mxu0 %v1330_v0 }
 0x205   :  { %1223 = vmatpush3.bf16.msra.mxu0 %v1222_v16 }
 0x206   :  { %1248 = vmatprep.subr.bf16.mxu0 %v1330_v0 }
 0x2bb   :  { %v315_v9 = vpop.f32.mrb[2].mxu0 }
 0x2bc   :  { %v316_v10 = vadd.f32 %v731_v8, %v315_v9  ;;  %v963_v11 = vpop.f32.mrb[3].mxu0 }
 0x2bd   :  { %v631_v11 = vld [vmem:[#allocation2 + $0x370] sm:$0xff] }
 0x2be   :  { %vm319_vm3 = vcmp.gt.f32.partialorder %v316_v10, 0.0  ;;  %v320_v12 = vmul.f32 0.01, %v316_v10 }
 0x2c0   :  { %v321_v13 = vsel %vm319_vm3, %v316_v10, %v320_v12  ;;  %v632_v12 = vld [vmem:[#allocation2 + $0x378] sm:$0xff] }
 0x2c1   :  { %997 = vmatmul.mubr.f32.vlgmr.msra.gmra.mrb[2].mxu1 %v321_v13  ;;  %v1270_v13 = vpack.c.bf16 %v632_v12, %v631_v11 }
 0x2c2   :  { %1066 = vmatprep.mubr.msk.f32.mxu1 %vm1331_vm0, %v1332_v1  ;;  %1226 = vmatpush3.bf16.msra.mxu1 %v1225_v20 }
 0x2c3   :  { %1227 = vmatprep.subr.bf16.mxu1 %v1330_v0 }
 0x2c6   :  { %1229 = vmatpush3.bf16.msra.mxu1 %v1228_v22 }
 0x2c7   :  { %1230 = vmatprep.subr.bf16.mxu1 %v1330_v0 }
 0x2ca   :  { %1232 = vmatpush3.bf16.msra.mxu1 %v1231_v25 }
 0x2cb   :  { %1233 = vmatprep.subr.bf16.mxu1 %v1330_v0 }
 0x2ce   :  { %1235 = vmatpush3.bf16.msra.mxu1 %v1234_v28 }
 0x2cf   :  { %1236 = vmatprep.subr.bf16.mxu1 %v1330_v0 }
 0x2d2   :  { %1238 = vmatpush3.bf16.msra.mxu1 %v1237_v31 }
 0x2d3   :  { %1239 = vmatprep.subr.bf16.mxu1 %v1330_v0 }
 0x2d6   :  { %1241 = vmatpush3.bf16.msra.mxu1 %v1240_v34 }
 0x2d7   :  { %1242 = vmatprep.subr.bf16.mxu1 %v1330_v0 }
 0x2da   :  { %1244 = vmatpush3.bf16.msra.mxu1 %v1243_v37 }
 0x2db   :  { %1245 = vmatprep.subr.bf16.mxu1 %v1330_v0 }
 0x2de   :  { %1247 = vmatpush3.bf16.msra.mxu1 %v1246_v46 }
 0x394   :  { %v413_v39 = vpop.f32.mrb[2].mxu1 }
 0x395   :  { %v414_v40 = vadd.f32 %v733_v38, %v413_v39  ;;  %v998_v41 = vpop.f32.mrb[3].mxu1 }
 0x397   :  { %vm417_vm4 = vcmp.gt.f32.partialorder %v414_v40, 0.0  ;;  %v418_v42 = vmul.f32 0.01, %v414_v40 }
 0x399   :  { %v419_v43 = vsel %vm417_vm4, %v414_v40, %v418_v42 }
 0x39a   :  { %1032 = vmatmul.mubr.f32.vlgmr.msra.gmra.mrb[4].mxu0 %v419_v43 }
 0x39b   :  { %1101 = vmatprep.mubr.msk.f32.mxu0 %vm1331_vm0, %v1332_v1  ;;  %1250 = vmatpush3.bf16.msra.mxu0 %v1249_v50  ;;  %v623_v1 = vld [vmem:[#allocation2 + $0x330] sm:$0xff] }
 0x39c   :  { %1251 = vmatprep.subr.bf16.mxu0 %v1330_v0  ;;  %v1258_v57 = vpack.c.bf16 %v624_v56, %v623_v1 }
 0x39f   :  { %1253 = vmatpush3.bf16.msra.mxu0 %v1252_v52 }
 0x3a0   :  { %1254 = vmatprep.subr.bf16.mxu0 %v1330_v0 }
 0x3a3   :  { %1256 = vmatpush3.bf16.msra.mxu0 %v1255_v55 }
 0x3a4   :  { %1257 = vmatprep.subr.bf16.mxu0 %v1330_v0 }
 0x3a7   :  { %1259 = vmatpush3.bf16.msra.mxu0 %v1258_v57 }
 0x3a8   :  { %1260 = vmatprep.subr.bf16.mxu0 %v1330_v0 }
 0x3ab   :  { %1262 = vmatpush3.bf16.msra.mxu0 %v1261_v60 }
 0x3ac   :  { %1263 = vmatprep.subr.bf16.mxu0 %v1330_v0 }
 0x3af   :  { %1265 = vmatpush3.bf16.msra.mxu0 %v1264_v63 }
 0x3b0   :  { %1266 = vmatprep.subr.bf16.mxu0 %v1330_v0 }
 0x3b3   :  { %1268 = vmatpush3.bf16.msra.mxu0 %v1267_v4 }
 0x3b4   :  { %1269 = vmatprep.subr.bf16.mxu0 %v1330_v0 }
 0x3b7   :  { %1271 = vmatpush3.bf16.msra.mxu0 %v1270_v13 }
 0x46d   :  { %v511_v6 = vpop.f32.mrb[4].mxu0 }
 0x46e   :  { %v512_v7 = vadd.f32 %v735_v5, %v511_v6  ;;  %v1033_v8 = vpop.f32.mrb[5].mxu0 }
 0x470   :  { %vm515_vm5 = vcmp.gt.f32.partialorder %v512_v7, 0.0  ;;  %v516_v9 = vmul.f32 0.01, %v512_v7 }
 0x472   :  { %v517_v10 = vsel %vm515_vm5, %v512_v7, %v516_v9 }
 0x473   :  { %1067 = vmatmul.mubr.f32.vlgmr.msra.gmra.mrb[4].mxu1 %v517_v10 }
 0x546   :  { %v609_v0 = vpop.f32.mrb[4].mxu1 }
 0x547   :  { %v610_v15 = vadd.f32 %v737_v14, %v609_v0  ;;  %v1068_v16 = vpop.f32.mrb[5].mxu1 }
 0x549   :  { %vm613_vm6 = vcmp.gt.f32.partialorder %v610_v15, 0.0  ;;  %v614_v17 = vmul.f32 0.01, %v610_v15 }
 0x54b   :  { %v615_v18 = vsel %vm613_vm6, %v610_v15, %v614_v17 }
 0x54c   :  { %1102 = vmatmul.mubr.f32.vlgmr.msra.gmra.mrb[6].mxu0 %v615_v18 }
 0x61f   :  { %v707_v20 = vpop.f32.mrb[6].mxu0 }
 0x620   :  { %v708_v21 = vadd.f32 %v739_v19, %v707_v20  ;;  %v1103_v22 = vpop.f32.mrb[7].mxu0 }
 0x622   :  { %711 = vst [vmem:[#allocation5] sm:$0xff] %v708_v21 }
 0x623   :  { %1312 = shalt.err (!%p1309_p12)
}
 0x624   :  { %s1313_s18 = scalar_lea.hbm %s1475_s3, 128 }
 0x625   :  { %p1314_p13 = scmp.ne.s32.totalorder %s1475_s3, %s1313_s18  ;;  %p1317_p0 = scmp.lt.u32.totalorder %s1313_s18, %s1475_s3 }
 0x627   :  { %p1319_p1 = pnand %p1317_p0, %p1314_p13 }
 0x629   :  { %1322 = shalt.err (!%p1319_p1)
}
 0x62a   :  { %721 = dma.vmem_to_hbm [thread:$0]  %s719_s14, 128, %s1475_s3, [#allocation4]  }
 0x62b   :  { %1325 = dma.done.wait [#allocation4], 128  }
 0x62c   :  { %1326 = vsyncadd [#allocation4], 4294967168 }
 0x62d   :  { %725 = vsyncpa [#allocation3], 1 }
 0x62e   :  { %726 = vsyncpa [#allocation4], 1 }

</bundles_post_ra>
